<compile_context>
chip_gen: v6e
topology: v6e:2x2x1
jax: 0.10.0
libtpu: 0.0.40
codegen_flags: <defaults>
</compile_context>

<pallas_src>
import functools
import math

import jax
import jax.numpy as jnp
from jax.experimental import pallas as pl
from jax.experimental.pallas import tpu as pltpu


def _mish(x):
    # Mish(x) = x * tanh(softplus(x)), PyTorch softplus threshold = 20.
    # tanh(log(1+e)) = ((1+e)^2-1)/((1+e)^2+1) = e(e+2)/(e(e+2)+2), computed
    # without cancellation.  For x > 20, tanh(softplus(x)) == 1.0 in f32.
    e = jnp.exp(jnp.minimum(x, 20.0))
    p = e * (e + 2.0)
    t = p * pl.reciprocal(p + 2.0, approx=True)
    t = jnp.where(x > 20.0, 1.0, t)
    return x * t


def _decode_block_kernel(x_ref, w1_ref, b1_ref, w2_ref, b2_ref, o_ref, *, wp):
    """One batch image per grid step, fully resident in VMEM.

    x_ref : (1, Cin, Lin)   reflection-padded input, spatially flattened
                            row-major with padded width `wp` (zero tail pad).
    w1_ref: (C1, Cin)       1x1 conv weight.
    b1_ref: (C1, 1)
    w2_ref: (Cout, 9*C1)    3x3 conv weight, K ordered (kh, kw, c).
    b2_ref: (Cout, 1)
    o_ref : (1, Cout, Lout) Lout = H_out * wp; columns >= W_out of each
                            flattened row are garbage, dropped by the wrapper.
    """
    x = x_ref[0]                                              # (Cin, Lin)

    # conv1 (1x1) + Mish, computed on the padded grid (pointwise, so this
    # equals reflection-padding the true conv1 output).
    h1 = jnp.dot(w1_ref[...], x, preferred_element_type=jnp.float32)
    h1 = _mish(h1 + b1_ref[...])                              # (C1, Lin)

    # conv2 (3x3, stride 1) as an in-VMEM im2col: 9 shifted lane-slices of h1
    # stacked along the contraction axis, then one MXU matmul.
    l_out = o_ref.shape[2]
    taps = []
    for kh in range(3):
        for kw in range(3):
            s = kh * wp + kw
            taps.append(h1[:, s:s + l_out])                   # (C1, Lout)
    patches = jnp.concatenate(taps, axis=0)                   # (9*C1, Lout)
    acc = jnp.dot(w2_ref[...], patches, preferred_element_type=jnp.float32)
    o_ref[0] = _mish(acc + b2_ref[...]).astype(o_ref.dtype)


def decode_block_forward(x, w1, b1, w2, b2, stride=1):
    """DecodeBlock forward. x: NCHW f32. w1: (C1,Cin,1,1), w2: (Cout,C1,3,3)."""
    n, cin, _, _ = x.shape
    c1 = w1.shape[0]
    cout = w2.shape[0]

    # conv1 has kernel 1 / pad 0, so its stride is a pure spatial subsample.
    if stride != 1:
        x = x[:, :, ::stride, ::stride]
    h_mid, w_mid = x.shape[2], x.shape[3]          # conv1 output spatial size

    # Reflection pad (pad=1) for the 3x3 conv, hoisted in front of the
    # pointwise 1x1 conv + Mish (they commute with padding).
    xp = jnp.pad(x, ((0, 0), (0, 0), (1, 1), (1, 1)), mode="reflect")
    hp, wp = h_mid + 2, w_mid + 2

    # Flatten the padded grid onto the lane axis; tail-pad so every shifted
    # tap slice stays in bounds and the input last dim is a 128 multiple.
    l_out = h_mid * wp                       # stride-1 3x3 output rows * wp
    l_in = ((hp * wp + 2 + 127) // 128) * 128
    x_flat = xp.reshape(n, cin, hp * wp)
    x_flat = jnp.pad(x_flat, ((0, 0), (0, 0), (0, l_in - hp * wp)))

    w1_mat = w1.reshape(c1, cin).astype(jnp.float32)
    b1_mat = b1.reshape(c1, 1).astype(jnp.float32)
    # K ordering (kh, kw, c) to match the tap-concatenation order.
    w2_mat = jnp.transpose(w2, (0, 2, 3, 1)).reshape(cout, 9 * c1)
    w2_mat = w2_mat.astype(jnp.float32)
    b2_mat = b2.reshape(cout, 1).astype(jnp.float32)

    out_flat = pl.pallas_call(
        functools.partial(_decode_block_kernel, wp=wp),
        out_shape=jax.ShapeDtypeStruct((n, cout, l_out), jnp.float32),
        grid_spec=pltpu.PrefetchScalarGridSpec(
            num_scalar_prefetch=0,
            grid=(n,),
            in_specs=[
                pl.BlockSpec((1, cin, l_in), lambda i: (i, 0, 0)),
                pl.BlockSpec((c1, cin), lambda i: (0, 0)),
                pl.BlockSpec((c1, 1), lambda i: (0, 0)),
                pl.BlockSpec((cout, 9 * c1), lambda i: (0, 0)),
                pl.BlockSpec((cout, 1), lambda i: (0, 0)),
            ],
            out_specs=pl.BlockSpec((1, cout, l_out), lambda i: (i, 0, 0)),
        ),
        compiler_params=pltpu.CompilerParams(
            dimension_semantics=("parallel",)),
    )(x_flat, w1_mat, b1_mat, w2_mat, b2_mat)

    # Keep the valid width columns of each flattened row; apply conv2 stride.
    out = out_flat.reshape(n, cout, h_mid, wp)[:, :, :, :w_mid]
    if stride != 1:
        out = out[:, :, ::stride, ::stride]
    return out


class DecodeBlockPallas:
    """Mirrors net11.DecodeBlock: ConvLayer3(in, in//2, 1, s) then
    ConvLayer3(in//2, out, 3, s), each = reflection_pad(k//2) + conv + Mish."""

    def __init__(self, in_channels, out_channels, kernel_size, stride, key):
        del kernel_size  # unused by the reference module's submodules
        c1 = in_channels // 2
        self.stride = stride
        k1, k2, k3, k4 = jax.random.split(key, 4)
        bound1 = 1.0 / math.sqrt(in_channels * 1 * 1)
        self.w1 = jax.random.uniform(k1, (c1, in_channels, 1, 1), jnp.float32,
                                     -bound1, bound1)
        self.b1 = jax.random.uniform(k2, (c1,), jnp.float32, -bound1, bound1)
        bound2 = 1.0 / math.sqrt(c1 * 3 * 3)
        self.w2 = jax.random.uniform(k3, (out_channels, c1, 3, 3), jnp.float32,
                                     -bound2, bound2)
        self.b2 = jax.random.uniform(k4, (out_channels,), jnp.float32,
                                     -bound2, bound2)

    def __call__(self, x):
        return decode_block_forward(x, self.w1, self.b1, self.w2, self.b2,
                                    self.stride)


def _reference_forward(x, w1, b1, w2, b2, stride):
    """Pure-JAX/XLA reference of the PyTorch DecodeBlock forward."""
    def mish(v):
        sp = jnp.where(v > 20.0, v, jnp.log1p(jnp.exp(jnp.minimum(v, 20.0))))
        return v * jnp.tanh(sp)

    def conv(v, w, b, s, pad):
        if pad:
            v = jnp.pad(v, ((0, 0), (0, 0), (pad, pad), (pad, pad)),
                        mode="reflect")
        o = jax.lax.conv_general_dilated(
            v, w, window_strides=(s, s), padding="VALID",
            dimension_numbers=("NCHW", "OIHW", "NCHW"),
            precision=jax.lax.Precision.HIGHEST)
        return o + b.reshape(1, -1, 1, 1)

    h = mish(conv(x, w1, b1, stride, 0))
    return mish(conv(h, w2, b2, stride, 1))


if __name__ == "__main__":
    key = jax.random.PRNGKey(0)
    k_param, k_x = jax.random.split(key)

    in_channels, out_channels, kernel_size, stride = 4, 8, 3, 1
    block = DecodeBlockPallas(in_channels, out_channels, kernel_size, stride,
                              k_param)

    x = jax.random.normal(k_x, (2, in_channels, 16, 16), dtype=jnp.float32)

    out = jax.jit(block)(x)
    out = jax.block_until_ready(out)
    assert out.shape == (2, out_channels, 16, 16), out.shape

    # Guard against layout/indexing mistakes (loose tol: Mish uses an
    # EUP-approximate reciprocal inside the kernel).
    ref = _reference_forward(x, block.w1, block.b1, block.w2, block.b2, stride)
    err = float(jnp.max(jnp.abs(out - ref)))
    assert err < 3e-2, f"max abs error vs reference: {err}"

    print("KERNEL_OK")
</pallas_src>

<mosaic_0001>
module attributes {stable_mosaic.version = 11 : i64} {
  func.func @_decode_block_kernel(%arg0: i32, %arg1: memref<1x4x384xf32, #tpu.memory_space<vmem>>, %arg2: memref<2x4xf32, #tpu.memory_space<vmem>>, %arg3: memref<2x1xf32, #tpu.memory_space<vmem>>, %arg4: memref<8x18xf32, #tpu.memory_space<vmem>>, %arg5: memref<8x1xf32, #tpu.memory_space<vmem>>, %arg6: memref<1x8x288xf32, #tpu.memory_space<vmem>>) attributes {dimension_semantics = [#tpu.dimension_semantics<parallel>], iteration_bounds = array<i64: 2>, scalar_prefetch = 0 : i64, scratch_operands = 0 : i64, tpu.core_type = #tpu.core_type<tc>, window_params = [{transform_indices = @transform_0, window_bounds = array<i64: 1, 4, 384>}, {pipeline_mode = #tpu.pipeline_mode<synchronous>, transform_indices = @transform_1, window_bounds = array<i64: 2, 4>}, {pipeline_mode = #tpu.pipeline_mode<synchronous>, transform_indices = @transform_2, window_bounds = array<i64: 2, 1>}, {pipeline_mode = #tpu.pipeline_mode<synchronous>, transform_indices = @transform_3, window_bounds = array<i64: 8, 18>}, {pipeline_mode = #tpu.pipeline_mode<synchronous>, transform_indices = @transform_4, window_bounds = array<i64: 8, 1>}, {transform_indices = @transform_5, window_bounds = array<i64: 1, 8, 288>}]} {
    %c0 = arith.constant 0 : index
    %c0_0 = arith.constant 0 : index
    %c0_1 = arith.constant 0 : index
    %0 = vector.load %arg1[%c0, %c0_0, %c0_1] : memref<1x4x384xf32, #tpu.memory_space<vmem>>, vector<1x4x384xf32>
    %1 = vector.shape_cast %0 : vector<1x4x384xf32> to vector<4x384xf32>
    %c0_2 = arith.constant 0 : index
    %c0_3 = arith.constant 0 : index
    %2 = vector.load %arg2[%c0_2, %c0_3] : memref<2x4xf32, #tpu.memory_space<vmem>>, vector<2x4xf32>
    %cst = arith.constant dense<0.000000e+00> : vector<2x384xf32>
    %3 = tpu.matmul %2, %1, %cst {dimension_numbers = #tpu.dot_dimension_numbers<[1], [0], [0], [1], [0, 0, 1, 1], [], []>} : vector<2x4xf32>, vector<4x384xf32>, vector<2x384xf32> -> vector<2x384xf32>
    %c0_4 = arith.constant 0 : index
    %c0_5 = arith.constant 0 : index
    %4 = vector.load %arg3[%c0_4, %c0_5] : memref<2x1xf32, #tpu.memory_space<vmem>>, vector<2x1xf32>
    %5 = vector.broadcast %4 : vector<2x1xf32> to vector<2x384xf32>
    %6 = arith.addf %3, %5 : vector<2x384xf32>
    %cst_6 = arith.constant 2.000000e+01 : f32
    %7 = vector.broadcast %cst_6 : f32 to vector<2x384xf32>
    %8 = arith.minimumf %6, %7 : vector<2x384xf32>
    %9 = math.exp %8 : vector<2x384xf32>
    %cst_7 = arith.constant 2.000000e+00 : f32
    %10 = vector.broadcast %cst_7 : f32 to vector<2x384xf32>
    %11 = arith.addf %9, %10 : vector<2x384xf32>
    %12 = arith.mulf %9, %11 : vector<2x384xf32>
    %cst_8 = arith.constant 2.000000e+00 : f32
    %13 = vector.broadcast %cst_8 : f32 to vector<2x384xf32>
    %14 = arith.addf %12, %13 : vector<2x384xf32>
    %15 = tpu.reciprocal %14 {approx = true} : vector<2x384xf32> -> vector<2x384xf32>
    %16 = arith.mulf %12, %15 : vector<2x384xf32>
    %cst_9 = arith.constant 2.000000e+01 : f32
    %17 = vector.broadcast %cst_9 : f32 to vector<2x384xf32>
    %18 = arith.cmpf ogt, %6, %17 : vector<2x384xf32>
    %cst_10 = arith.constant 1.000000e+00 : f32
    %19 = vector.broadcast %cst_10 : f32 to vector<2x384xf32>
    %20 = arith.select %18, %19, %16 : vector<2x384xi1>, vector<2x384xf32>
    %21 = arith.mulf %6, %20 : vector<2x384xf32>
    %22 = vector.extract_strided_slice %21 {offsets = [0, 0], sizes = [2, 288], strides = [1, 1]} : vector<2x384xf32> to vector<2x288xf32>
    %23 = vector.extract_strided_slice %21 {offsets = [0, 1], sizes = [2, 288], strides = [1, 1]} : vector<2x384xf32> to vector<2x288xf32>
    %24 = vector.extract_strided_slice %21 {offsets = [0, 2], sizes = [2, 288], strides = [1, 1]} : vector<2x384xf32> to vector<2x288xf32>
    %25 = vector.extract_strided_slice %21 {offsets = [0, 18], sizes = [2, 288], strides = [1, 1]} : vector<2x384xf32> to vector<2x288xf32>
    %26 = vector.extract_strided_slice %21 {offsets = [0, 19], sizes = [2, 288], strides = [1, 1]} : vector<2x384xf32> to vector<2x288xf32>
    %27 = vector.extract_strided_slice %21 {offsets = [0, 20], sizes = [2, 288], strides = [1, 1]} : vector<2x384xf32> to vector<2x288xf32>
    %28 = vector.extract_strided_slice %21 {offsets = [0, 36], sizes = [2, 288], strides = [1, 1]} : vector<2x384xf32> to vector<2x288xf32>
    %29 = vector.extract_strided_slice %21 {offsets = [0, 37], sizes = [2, 288], strides = [1, 1]} : vector<2x384xf32> to vector<2x288xf32>
    %30 = vector.extract_strided_slice %21 {offsets = [0, 38], sizes = [2, 288], strides = [1, 1]} : vector<2x384xf32> to vector<2x288xf32>
    %31 = tpu.concatenate %22, %23, %24, %25, %26, %27, %28, %29, %30 in 0 : vector<2x288xf32>, vector<2x288xf32>, vector<2x288xf32>, vector<2x288xf32>, vector<2x288xf32>, vector<2x288xf32>, vector<2x288xf32>, vector<2x288xf32>, vector<2x288xf32> -> vector<18x288xf32>
    %c0_11 = arith.constant 0 : index
    %c0_12 = arith.constant 0 : index
    %32 = vector.load %arg4[%c0_11, %c0_12] : memref<8x18xf32, #tpu.memory_space<vmem>>, vector<8x18xf32>
    %cst_13 = arith.constant dense<0.000000e+00> : vector<8x288xf32>
    %33 = tpu.matmul %32, %31, %cst_13 {dimension_numbers = #tpu.dot_dimension_numbers<[1], [0], [0], [1], [0, 0, 1, 1], [], []>} : vector<8x18xf32>, vector<18x288xf32>, vector<8x288xf32> -> vector<8x288xf32>
    %c0_14 = arith.constant 0 : index
    %c0_15 = arith.constant 0 : index
    %34 = vector.load %arg5[%c0_14, %c0_15] : memref<8x1xf32, #tpu.memory_space<vmem>>, vector<8x1xf32>
    %35 = vector.broadcast %34 : vector<8x1xf32> to vector<8x288xf32>
    %36 = arith.addf %33, %35 : vector<8x288xf32>
    %cst_16 = arith.constant 2.000000e+01 : f32
    %37 = vector.broadcast %cst_16 : f32 to vector<8x288xf32>
    %38 = arith.minimumf %36, %37 : vector<8x288xf32>
    %39 = math.exp %38 : vector<8x288xf32>
    %cst_17 = arith.constant 2.000000e+00 : f32
    %40 = vector.broadcast %cst_17 : f32 to vector<8x288xf32>
    %41 = arith.addf %39, %40 : vector<8x288xf32>
    %42 = arith.mulf %39, %41 : vector<8x288xf32>
    %cst_18 = arith.constant 2.000000e+00 : f32
    %43 = vector.broadcast %cst_18 : f32 to vector<8x288xf32>
    %44 = arith.addf %42, %43 : vector<8x288xf32>
    %45 = tpu.reciprocal %44 {approx = true} : vector<8x288xf32> -> vector<8x288xf32>
    %46 = arith.mulf %42, %45 : vector<8x288xf32>
    %cst_19 = arith.constant 2.000000e+01 : f32
    %47 = vector.broadcast %cst_19 : f32 to vector<8x288xf32>
    %48 = arith.cmpf ogt, %36, %47 : vector<8x288xf32>
    %cst_20 = arith.constant 1.000000e+00 : f32
    %49 = vector.broadcast %cst_20 : f32 to vector<8x288xf32>
    %50 = arith.select %48, %49, %46 : vector<8x288xi1>, vector<8x288xf32>
    %51 = arith.mulf %36, %50 : vector<8x288xf32>
    %c0_21 = arith.constant 0 : index
    %c0_22 = arith.constant 0 : index
    %c0_23 = arith.constant 0 : index
    %52 = vector.load %arg6[%c0_21, %c0_22, %c0_23] : memref<1x8x288xf32, #tpu.memory_space<vmem>>, vector<1x8x288xf32>
    %53 = vector.shape_cast %52 : vector<1x8x288xf32> to vector<8x288xf32>
    %54 = vector.shape_cast %51 : vector<8x288xf32> to vector<1x8x288xf32>
    tpu.vector_store %arg6[%c0_21, %c0_22, %c0_23], %54 {strides = array<i32>} : memref<1x8x288xf32, #tpu.memory_space<vmem>>, vector<1x8x288xf32>,
    return
  }
  func.func @transform_0(%arg0: i32) -> (i32, i32, i32) {
    %c0_i32 = arith.constant 0 : i32
    %c0_i32_0 = arith.constant 0 : i32
    %c0_i32_1 = arith.constant 0 : i32
    return %arg0, %c0_i32, %c0_i32_0 : i32, i32, i32
  }
  func.func @transform_1(%arg0: i32) -> (i32, i32) {
    %c0_i32 = arith.constant 0 : i32
    %c0_i32_0 = arith.constant 0 : i32
    %c0_i32_1 = arith.constant 0 : i32
    return %c0_i32, %c0_i32_0 : i32, i32
  }
  func.func @transform_2(%arg0: i32) -> (i32, i32) {
    %c0_i32 = arith.constant 0 : i32
    %c0_i32_0 = arith.constant 0 : i32
    %c0_i32_1 = arith.constant 0 : i32
    return %c0_i32, %c0_i32_0 : i32, i32
  }
  func.func @transform_3(%arg0: i32) -> (i32, i32) {
    %c0_i32 = arith.constant 0 : i32
    %c0_i32_0 = arith.constant 0 : i32
    %c0_i32_1 = arith.constant 0 : i32
    return %c0_i32, %c0_i32_0 : i32, i32
  }
  func.func @transform_4(%arg0: i32) -> (i32, i32) {
    %c0_i32 = arith.constant 0 : i32
    %c0_i32_0 = arith.constant 0 : i32
    %c0_i32_1 = arith.constant 0 : i32
    return %c0_i32, %c0_i32_0 : i32, i32
  }
  func.func @transform_5(%arg0: i32) -> (i32, i32, i32) {
    %c0_i32 = arith.constant 0 : i32
    %c0_i32_0 = arith.constant 0 : i32
    %c0_i32_1 = arith.constant 0 : i32
    return %arg0, %c0_i32, %c0_i32_0 : i32, i32, i32
  }
}

</mosaic_0001>

<bundles_post_ra>
// kernel: _unnamed_function_.1
= control target key start
LH: loop header
LB: loop body
LE: loop exit
PB: predicated region body
PF: predicated region fallthrough
CT: control target
= control target key end

     0   :  { %s933_s18 = smov 0   ;;  %s1029_s0 = inlined_call_operand.vmem [shape: f32[2,4,384], index: 0, kind: input, shape index: {}]   ;;  %s1030_s1 = inlined_call_operand.vmem [shape: f32[2,4], index: 1, kind: input, shape index: {}]   ;;  %s1031_s2 = inlined_call_operand.vmem [shape: f32[2,1], index: 2, kind: input, shape index: {}]   ;;  %s1032_s3 = inlined_call_operand.vmem [shape: f32[8,18], index: 3, kind: input, shape index: {}]   ;;  %s1033_s4 = inlined_call_operand.vmem [shape: f32[8,1], index: 4, kind: input, shape index: {}]   ;;  %s1034_s5 = inlined_call_operand.vmem [shape: f32[2,8,288], index: 5, kind: output, shape index: {}]  }
   0x1 LB: > { %s797_s19 = sadd.s32 4294967295, %s890_s18   ;;  %p801_p0 = scmp.ge.s32.totalorder %s890_s18, 1  ;;  %s890_s18 = sphi %s933_s18, %s15_s18  }
   0x2   : > { %p187_p1 = scmp.lt.s32.totalorder %s890_s18, 3 }
   0x4   : > { %p188_p2 = pnand %p801_p0, %p187_p1 }
   0x5   : > { %p215_p3 = scmp.lt.s32.totalorder (!%p188_p2), %s797_s19, 1  ;;  %s895_s28 = smov (!%p188_p2), 90  }
   0x6   : > { %191 = sbr.rel (%p188_p2) target bundleno = 659 (0x293), region = 40  ;;  %s896_s29 = smov (!%p188_p2), 109  }
   0x7   : > { %s897_s30 = smov (!%p188_p2), 91   ;;  %s898_s6 = smov (!%p188_p2), 108  }
   0x8   : > { %s899_s7 = smov (!%p188_p2), 126   ;;  %s900_s8 = smov (!%p188_p2), 92  }
   0x9   : > { %s901_s9 = smov (!%p188_p2), 127   ;;  %s902_s10 = smov (!%p188_p2), 110  }
   0xb   : > { %v892_v0 = vmov 0.0   ;;  %vm893_vm0 = vmmov 0   ;;  %v228_v1 = vld [vmem:[%s1031_s2] sm:$0x3]  ;;  %s1036_s19 = smov (!%p215_p3, %s797_s19), 1  ;;  %v894_v2 = vmov 0  }
   0xc   : > { %822 = vmatprep.subr.mxu1 %v892_v0  ;;  %824 = vmatprep.mubr.msk.f32.mxu1 %vm893_vm0, %v892_v0  ;;  %s836_s22 = smul.u32 12, %s1036_s19  ;;  %vm241_vm1 = vcmask 1043456   ;;  %v227_v3 = vld [vmem:[%s1030_s1] sm:$0x3]  ;;  %vm237_vm2 = vcmask 31744   ;;  %vm527_vm6 = vcmask 1041408  }
   0xd   : > { %312 = vmatprep.mubr.f32.mxu0 %v892_v0  ;;  %857 = vset.pattern.permute.xlu0 %v894_v2  ;;  %v548_v54 = vld [vmem:[%s1033_s4] sm:$0xff]  ;;  %vm534_vm7 = vcmask 1045504   ;;  %vm524_vm8 = vcmask 736256   ;;  %vm488_vm9 = vcmask 883712   ;;  %vm476_vm10 = vcmask 891904   ;;  %s837_s15 = smul.u32 24, %s1036_s19 }
   0xe   : > { %231 = vperm.xlu0 %857, %v228_v1   ;;  %858 = vset.pattern.permute.xlu1 %v894_v2  ;;  %s219_s25 = scalar_lea.vmem %s1029_s0, %s836_s22  ;;  %vm500_vm11 = vcmask 752640   ;;  %vm512_vm12 = vcmask 744448   ;;  %vm434_vm13 = vcmask 1039360   ;;  %vm449_vm14 = vcmask 1031168  }
   0xf   : > { %v226_v4 = vld [vmem:[%s219_s25 + $0x8] sm:$0xf]  ;;  %v225_v5 = vld [vmem:[%s219_s25] sm:$0xff]  ;;  %vm464_vm15 = vcmask 900096   ;;  %s224_s20 = scalar_lea.vmem %s1034_s5, %s837_s15 }
  0x10   : > { %823 = vmatpush3.msk.msra.mxu1 %vm241_vm1, %v226_v4  ;;  %v236_v6 = vcombine.high %v225_v5, %v225_v5 }
  0x11   : > { %825 = vmatmul.mubr.msk.f32.vlgmr.msra.gmra.mxu1 %vm237_vm2, %v227_v3  ;;  %827 = vmatprep.subr.mxu1 %v892_v0 }
  0x12   : > { %804 = vmatprep.subr.msk.mxu0 %vm241_vm1, %v236_v6  ;;  %833 = vmatprep.mubr.msk.f32.mxu1 %vm893_vm0, %v892_v0  ;;  %vm554_vm0 = vcmask 146432  }
  0x13   : > { %805 = vmatpush1.msk.msra.mxu0 %vm241_vm1, %v225_v5 }
  0x14   : > { %806 = vmatmul.mubr.msk.f32.vlgmr.msra.gmra.mxu0 %vm237_vm2, %v227_v3  ;;  %vm740_vm2 = vcmask 261120  }
  0x15   : > { %628 = vmatprep.mubr.f32.mxu0 %v892_v0 }
  0x89   : > { %v232_v7 = vpop.permute.xlu0 %231 }
  0xd1   : > { %v385_v8 = vpop.f32.mrf.mxu1 }
  0xd2   : > { %v386_v9 = vadd.f32 %v385_v8, %v232_v7 }
  0xd3   : > { %v826_v10 = vpop.f32.mrf.mxu1 }
  0xd4   : > { %v391_v11 = vmin.f32 %v386_v9, 20.0  ;;  %v314_v12 = vpop.f32.mrf.mxu0  ;;  %vm415_vm3 = vcmp.gt.f32.partialorder %v386_v9, 20.0 }
  0xd5   : > { %v315_v13 = vadd.f32 %v314_v12, %v232_v7 }
  0xd6   : > { %v396_v14 = vmul.f32 1.442695, %v391_v11  ;;  %v316_v15 = vpop.f32.mrf.mxu0 }
  0xd7   : > { %v389_v16 = vmin.f32 %v315_v13, 20.0  ;;  %v317_v17 = vadd.f32 %v316_v15, %v232_v7  ;;  %vm413_vm4 = vcmp.gt.f32.partialorder %v315_v13, 20.0 }
  0xd8   : > { %860 = vpow2.f32 %v396_v14 }
  0xd9   : > { %v392_v18 = vmul.f32 1.442695, %v389_v16  ;;  %v390_v19 = vmin.f32 %v317_v17, 20.0  ;;  %vm414_vm5 = vcmp.gt.f32.partialorder %v317_v17, 20.0 }
  0xdb   : > { %862 = vpow2.f32 %v392_v18  ;;  %v394_v20 = vmul.f32 1.442695, %v390_v19 }
  0xdd   : > { %864 = vpow2.f32 %v394_v20 }
  0xe5   : > { %v861_v21 = vpop.eup %860 }
  0xe6   : > { %v400_v22 = vadd.f32 2.0, %v861_v21 }
  0xe8   : > { %v863_v23 = vpop.eup %862  ;;  %v403_v24 = vmul.f32 %v861_v21, %v400_v22 }
  0xe9   : > { %v398_v25 = vadd.f32 2.0, %v863_v23 }
  0xea   : > { %v865_v26 = vpop.eup %864  ;;  %v406_v27 = vadd.f32 2.0, %v403_v24 }
  0xeb   : > { %v401_v28 = vmul.f32 %v863_v23, %v398_v25  ;;  %v399_v29 = vadd.f32 2.0, %v865_v26 }
  0xec   : > { %866 = vrcp.f32 %v406_v27 }
  0xed   : > { %v404_v30 = vadd.f32 2.0, %v401_v28  ;;  %v402_v31 = vmul.f32 %v865_v26, %v399_v29 }
  0xef   : > { %868 = vrcp.f32 %v404_v30  ;;  %v405_v32 = vadd.f32 2.0, %v402_v31 }
  0xf1   : > { %870 = vrcp.f32 %v405_v32 }
  0xf9   : > { %v867_v33 = vpop.eup %866 }
  0xfa   : > { %v412_v34 = vmul.f32 %v867_v33, %v403_v24 }
  0xfc   : > { %v418_v35 = vsel %vm415_vm3, 1.0, %v412_v34  ;;  %v869_v37 = vpop.eup %868 }
  0xfd   : > { %v964_v36 = vmul.f32 %v418_v35, %v386_v9  ;;  %v410_v40 = vmul.f32 %v869_v37, %v401_v28 }
  0xfe   : > { %v871_v41 = vpop.eup %870 }
  0xff   : > { %522 = vrot.lane.b32.xlu0 %v964_v36, %s895_s28  ;;  %474 = vrot.lane.b32.xlu1 %v964_v36, %s896_s29  ;;  %v457_v38 = vrot.slane %v964_v36, 2  ;;  %v427_v39 = vrot.slane %v964_v36, 6  ;;  %v442_v42 = vrot.slane %v964_v36, 4  ;;  %v416_v43 = vsel %vm413_vm4, 1.0, %v410_v40 }
 0x100   : > { %v411_v44 = vmul.f32 %v871_v41, %v402_v31  ;;  %v972_v45 = vmul.f32 %v416_v43, %v315_v13  ;;  %v547_v43 = vld [vmem:[%s1032_s3] sm:$0xff] }
 0x102   : > { %v417_v46 = vsel %vm414_vm5, 1.0, %v411_v44  ;;  %v440_v48 = vrot.slane %v972_v45, 4  ;;  %v425_v49 = vrot.slane %v972_v45, 6  ;;  %v455_v50 = vrot.slane %v972_v45, 2 }
 0x103   : > { %510 = vrot.lane.b32.xlu1 %v457_v38, %s897_s30  ;;  %486 = vrot.lane.b32.xlu0 %v427_v39, %s898_s6  ;;  %v975_v47 = vmul.f32 %v417_v46, %v317_v17 }
 0x105   : > { %v426_v51 = vrot.slane %v975_v47, 6  ;;  %v456_v52 = vrot.slane %v975_v47, 2  ;;  %v441_v53 = vrot.slane %v975_v47, 4 }
 0x107   : > { %447 = vrot.lane.b32.xlu1 %v442_v42, %s899_s7  ;;  %498 = vrot.lane.b32.xlu0 %v442_v42, %s900_s8 }
 0x10b   : > { %432 = vrot.lane.b32.xlu0 %v427_v39, %s901_s9  ;;  %470 = vrot.lane.b32.xlu1 %v972_v45, %s896_s29 }
 0x10f   : > { %518 = vrot.lane.b32.xlu0 %v972_v45, %s895_s28  ;;  %520 = vrot.lane.b32.xlu1 %v975_v47, %s895_s28 }
 0x113   : > { %472 = vrot.lane.b32.xlu0 %v975_v47, %s896_s29  ;;  %494 = vrot.lane.b32.xlu1 %v440_v48, %s900_s8 }
 0x117   : > { %428 = vrot.lane.b32.xlu1 %v425_v49, %s901_s9  ;;  %482 = vrot.lane.b32.xlu0 %v425_v49, %s898_s6 }
 0x11b   : > { %443 = vrot.lane.b32.xlu1 %v440_v48, %s899_s7  ;;  %506 = vrot.lane.b32.xlu0 %v455_v50, %s897_s30 }
 0x11f   : > { %484 = vrot.lane.b32.xlu1 %v426_v51, %s898_s6  ;;  %508 = vrot.lane.b32.xlu0 %v456_v52, %s897_s30 }
 0x123   : > { %496 = vrot.lane.b32.xlu1 %v441_v53, %s900_s8  ;;  %445 = vrot.lane.b32.xlu0 %v441_v53, %s899_s7 }
 0x127   : > { %430 = vrot.lane.b32.xlu1 %v426_v51, %s901_s9  ;;  %460 = vrot.lane.b32.xlu0 %v456_v52, %s902_s10 }
 0x12b   : > { %462 = vrot.lane.b32.xlu1 %v457_v38, %s902_s10  ;;  %458 = vrot.lane.b32.xlu0 %v455_v50, %s902_s10 }
 0x12f   : > { %551 = vperm.xlu1 %858, %v548_v54  }
 0x171   : > { %v523_v55 = vpop.permute.xlu0 %522  ;;  %v475_v56 = vpop.permute.xlu1 %474 }
 0x172   : > { %828 = vmatpush3.msk.msra.mxu1 %vm527_vm6, %v523_v55 }
 0x173   : > { %829 = vmatprep.subr.mxu1 %v892_v0 }
 0x175   : > { %v511_v57 = vpop.permute.xlu1 %510  ;;  %v487_v58 = vpop.permute.xlu0 %486 }
 0x176   : > { %v540_v59 = vsel %vm527_vm6, %v475_v56, %v487_v58 }
 0x179   : > { %v448_v60 = vpop.permute.xlu1 %447  ;;  %v499_v61 = vpop.permute.xlu0 %498 }
 0x17a   : > { %v543_v62 = vsel %vm241_vm1, %v540_v59, %v499_v61 }
 0x17b   : > { %v546_v63 = vsel %vm534_vm7, %v543_v62, %v511_v57 }
 0x17c   : > { %830 = vmatpush3.msra.mxu1 %v546_v63 }
 0x17d   : > { %v433_v1 = vpop.permute.xlu0 %432  ;;  %v471_v2 = vpop.permute.xlu1 %470  ;;  %831 = vmatprep.subr.mxu1 %v892_v0 }
 0x17e   : > { %v530_v32 = vsel %vm527_vm6, %v964_v36, %v433_v1 }
 0x17f   : > { %v533_v40 = vsel %vm241_vm1, %v530_v32, %v448_v60 }
 0x181   : > { %v519_v3 = vpop.permute.xlu0 %518  ;;  %v521_v4 = vpop.permute.xlu1 %520 }
 0x182   : > { %v525_v5 = vsel %vm524_vm8, %v519_v3, %v521_v4  ;;  %v526_v6 = vsel %vm524_vm8, %v521_v4, %v523_v55 }
 0x183   : > { %809 = vmatprep.subr.msk.mxu0 %vm527_vm6, %v526_v6 }
 0x184   : > { %810 = vmatpush1.msk.msra.mxu0 %vm527_vm6, %v525_v5 }
 0x185   : > { %v473_v7 = vpop.permute.xlu0 %472  ;;  %v495_v8 = vpop.permute.xlu1 %494 }
 0x186   : > { %v477_v16 = vsel %vm476_vm10, %v471_v2, %v473_v7  ;;  %v478_v17 = vsel %vm476_vm10, %v473_v7, %v475_v56 }
 0x189   : > { %v429_v9 = vpop.permute.xlu1 %428  ;;  %v483_v10 = vpop.permute.xlu0 %482 }
 0x18d   : > { %v444_v11 = vpop.permute.xlu1 %443  ;;  %v507_v12 = vpop.permute.xlu0 %506 }
 0x191   : > { %v485_v13 = vpop.permute.xlu1 %484  ;;  %v509_v14 = vpop.permute.xlu0 %508 }
 0x192   : > { %v489_v0 = vsel %vm488_vm9, %v483_v10, %v485_v13  ;;  %v490_v15 = vsel %vm488_vm9, %v485_v13, %v487_v58  ;;  %v513_v24 = vsel %vm512_vm12, %v507_v12, %v509_v14  ;;  %v514_v25 = vsel %vm512_vm12, %v509_v14, %v511_v57 }
 0x193   : > { %v538_v20 = vsel %vm527_vm6, %v477_v16, %v489_v0  ;;  %v539_v21 = vsel %vm527_vm6, %v478_v17, %v490_v15 }
 0x195   : > { %v497_v18 = vpop.permute.xlu1 %496  ;;  %v446_v19 = vpop.permute.xlu0 %445 }
 0x196   : > { %v501_v22 = vsel %vm500_vm11, %v495_v8, %v497_v18  ;;  %v502_v23 = vsel %vm500_vm11, %v497_v18, %v499_v61  ;;  %v451_v38 = vsel %vm449_vm14, %v446_v19, %v448_v60  ;;  %v450_v39 = vsel %vm449_vm14, %v444_v11, %v446_v19 }
 0x197   : > { %v541_v26 = vsel %vm241_vm1, %v538_v20, %v501_v22  ;;  %v542_v27 = vsel %vm241_vm1, %v539_v21, %v502_v23 }
 0x198   : > { %v545_v28 = vsel %vm534_vm7, %v542_v27, %v514_v25  ;;  %v544_v29 = vsel %vm534_vm7, %v541_v26, %v513_v24 }
 0x199   : > { %v431_v30 = vpop.permute.xlu1 %430  ;;  %592 = vmatprep.subr.mxu0 %v545_v28  ;;  %v461_v31 = vpop.permute.xlu0 %460 }
 0x19a   : > { %v435_v33 = vsel %vm434_vm13, %v429_v9, %v431_v30  ;;  %v436_v34 = vsel %vm434_vm13, %v431_v30, %v433_v1  ;;  %593 = vmatpush1.msra.mxu0 %v544_v29 }
 0x19b   : > { %v528_v35 = vsel %vm527_vm6, %v972_v45, %v435_v33  ;;  %v529_v37 = vsel %vm527_vm6, %v975_v47, %v436_v34 }
 0x19c   : > { %v532_v36 = vsel %vm241_vm1, %v529_v37, %v451_v38  ;;  %v531_v47 = vsel %vm241_vm1, %v528_v35, %v450_v39 }
 0x19d   : > { %v463_v41 = vpop.permute.xlu1 %462  ;;  %v459_v42 = vpop.permute.xlu0 %458 }
 0x19e   : > { %v466_v44 = vsel %vm464_vm15, %v461_v31, %v463_v41  ;;  %v537_v45 = vsel %vm534_vm7, %v533_v40, %v463_v41  ;;  %v465_v46 = vsel %vm464_vm15, %v459_v42, %v461_v31 }
 0x19f   : > { %832 = vmatpush3.msra.mxu1 %v537_v45  ;;  %v536_v48 = vsel %vm534_vm7, %v532_v36, %v466_v44  ;;  %v535_v49 = vsel %vm534_vm7, %v531_v47, %v465_v46 }
 0x1a0   : > { %594 = vmatprep.subr.mxu0 %v536_v48  ;;  %834 = vmatmul.mubr.msk.f32.vlgmr.msra.gmra.mxu1 %vm554_vm0, %v547_v43 }
 0x1a1   : > { %595 = vmatpush1.msra.mxu0 %v535_v49 }
 0x1a2   : > { %811 = vmatmul.mubr.msk.f32.vlgmr.msra.gmra.mxu0 %vm554_vm0, %v547_v43 }
 0x1aa   : > { %v552_v50 = vpop.permute.xlu1 %551 }
 0x260   : > { %v701_v51 = vpop.f32.mrf.mxu1 }
 0x261   : > { %v702_v52 = vadd.f32 %v701_v51, %v552_v50 }
 0x262   : > { %v630_v53 = vpop.f32.mrf.mxu0  ;;  %v835_v54 = vpop.f32.mrf.mxu1 }
 0x263   : > { %v707_v55 = vmin.f32 %v702_v52, 20.0  ;;  %v631_v56 = vadd.f32 %v630_v53, %v552_v50  ;;  %vm731_vm1 = vcmp.gt.f32.partialorder %v702_v52, 20.0 }
 0x264   : > { %v632_v57 = vpop.f32.mrf.mxu0 }
 0x265   : > { %v712_v58 = vmul.f32 1.442695, %v707_v55  ;;  %v705_v59 = vmin.f32 %v631_v56, 20.0  ;;  %v633_v60 = vadd.f32 %v632_v57, %v552_v50  ;;  %vm729_vm3 = vcmp.gt.f32.partialorder %v631_v56, 20.0 }
 0x267   : > { %872 = vpow2.f32 %v712_v58  ;;  %v708_v61 = vmul.f32 1.442695, %v705_v59  ;;  %v706_v62 = vmin.f32 %v633_v60, 20.0  ;;  %vm730_vm4 = vcmp.gt.f32.partialorder %v633_v60, 20.0 }
 0x269   : > { %874 = vpow2.f32 %v708_v61  ;;  %v710_v63 = vmul.f32 1.442695, %v706_v62 }
 0x26b   : > { %876 = vpow2.f32 %v710_v63 }
 0x274   : > { %v873_v1 = vpop.eup %872 }
 0x275   : > { %v716_v2 = vadd.f32 2.0, %v873_v1 }
 0x276   : > { %v875_v3 = vpop.eup %874 }
 0x277   : > { %v719_v4 = vmul.f32 %v873_v1, %v716_v2  ;;  %v714_v5 = vadd.f32 2.0, %v875_v3 }
 0x278   : > { %v877_v6 = vpop.eup %876 }
 0x279   : > { %v722_v7 = vadd.f32 2.0, %v719_v4  ;;  %v717_v8 = vmul.f32 %v875_v3, %v714_v5  ;;  %v715_v9 = vadd.f32 2.0, %v877_v6 }
 0x27b   : > { %878 = vrcp.f32 %v722_v7  ;;  %v720_v10 = vadd.f32 2.0, %v717_v8  ;;  %v718_v11 = vmul.f32 %v877_v6, %v715_v9 }
 0x27d   : > { %880 = vrcp.f32 %v720_v10  ;;  %v721_v12 = vadd.f32 2.0, %v718_v11 }
 0x27f   : > { %882 = vrcp.f32 %v721_v12 }
 0x288   : > { %v879_v13 = vpop.eup %878 }
 0x289   : > { %v728_v14 = vmul.f32 %v879_v13, %v719_v4 }
 0x28a   : > { %v881_v0 = vpop.eup %880 }
 0x28b   : > { %v734_v15 = vsel %vm731_vm1, 1.0, %v728_v14  ;;  %v726_v16 = vmul.f32 %v881_v0, %v717_v8 }
 0x28c   : > { %v883_v17 = vpop.eup %882  ;;  %v737_v18 = vmul.f32 %v734_v15, %v702_v52 }
 0x28d   : > { %v732_v19 = vsel %vm729_vm3, 1.0, %v726_v16  ;;  %v727_v20 = vmul.f32 %v883_v17, %v718_v11 }
 0x28e   : > { %741 = vst.msk [vmem:[%s224_s20 + $0x10] sm:$0xff] %vm740_vm2, %v737_v18  ;;  %v735_v21 = vmul.f32 %v732_v19, %v631_v56 }
 0x28f   : > { %v733_v22 = vsel %vm730_vm4, 1.0, %v727_v20 }
 0x290   : > { %738 = vst [vmem:[%s224_s20] sm:$0xff] %v735_v21  ;;  %v736_v23 = vmul.f32 %v733_v22, %v633_v60 }
 0x292   : > { %739 = vst [vmem:[%s224_s20 + $0x8] sm:$0xff] %v736_v23 }
 0x293 PF: > { %s15_s18 = sadd.s32 1, %s890_s18  }
 0x294   : > { %p12_p4 = scmp.ge.s32.totalorder %s15_s18, 4  }
 0x296   :  { %14 = sbr.rel (!%p12_p4) target bundleno = 1 (0x1), region = 70 }

</bundles_post_ra>
